<compile_context>
chip_gen: v6e
topology: v6e:2x2x1
jax: 0.10.0
libtpu: 0.0.40
codegen_flags: <defaults>
</compile_context>

<pallas_src>
import functools

import jax
import jax.numpy as jnp
from jax import lax
from jax.experimental import pallas as pl
from jax.experimental.pallas import tpu as pltpu

# ---- module hyper-parameters (globals in the reference code) ----------------
EMBD_DIM = 32        # C  (embd_dim)
HEAD_DIM = 16        # head_dim
CONTEXT_SIZE = 8     # context_size (== T here)
BATCH = 2


def _attn_kernel(x_ref, wqkv_ref, o_ref, *, head_dim):
    """Single invocation over the whole batch.

    x_ref    : (B, T, C)   VMEM
    wqkv_ref : (C, 3H)     VMEM  (Q weight pre-scaled by C**-0.5)
    o_ref    : (B, T, H)   VMEM
    """
    B, T, C = x_ref.shape
    H = head_dim

    # Fused QKV projection: one MXU matmul over the flattened batch*seq rows.
    x2d = x_ref[...].reshape(B * T, C)                               # (B*T, C)
    qkv = jnp.dot(x2d, wqkv_ref[...],
                  preferred_element_type=jnp.float32)                # (B*T, 3H)

    q = qkv[:, 0 * H:1 * H].reshape(B, T, H)   # scale already folded into Wq
    k = qkv[:, 1 * H:2 * H].reshape(B, T, H)
    v = qkv[:, 2 * H:3 * H].reshape(B, T, H)

    # Attention scores: contract on the last axis of both q and k (no explicit
    # k transpose / XLU relayout).  Scale (C**-0.5, C = embd_dim, exactly as
    # the PyTorch module — not head_dim) was folded into Wq on the host.
    scores = jnp.einsum("btd,bsd->bts", q, k,
                        preferred_element_type=jnp.float32)          # (B, T, T)

    # Causal mask: position t may attend to positions <= t.  Use a large
    # finite negative instead of -inf so exp() never sees inf-inf.
    row = lax.broadcasted_iota(jnp.int32, (T, T), 0)
    col = lax.broadcasted_iota(jnp.int32, (T, T), 1)
    neg_big = jnp.float32(jnp.finfo(jnp.float32).min / 2)
    scores = jnp.where((col <= row)[None, :, :], scores, neg_big)

    # Softmax along the last axis; the divide goes to the EUP via reciprocal.
    m = jnp.max(scores, axis=-1, keepdims=True)
    e = jnp.exp(scores - m)
    p = e * pl.reciprocal(jnp.sum(e, axis=-1, keepdims=True), approx=True)

    # dropout(p) -> identity in eval mode

    # Weighted sum of values.
    out = jnp.einsum("bts,bsd->btd", p, v,
                     preferred_element_type=jnp.float32)             # (B, T, H)
    o_ref[...] = out.astype(o_ref.dtype)


def attention(x, wq_t, wk_t, wv_t):
    """x: (B, T, C) float32; w*_t: (C, H) float32.  Returns (B, T, H)."""
    B, T, C = x.shape
    H = wq_t.shape[1]
    assert T <= CONTEXT_SIZE

    # Host-side weight prep: fold the C**-0.5 score scale into Wq and fuse the
    # three projections into one (C, 3H) matrix.
    scale = C ** (-0.5)
    w_qkv = jnp.concatenate([wq_t * scale, wk_t, wv_t], axis=1)       # (C, 3H)

    kernel = functools.partial(_attn_kernel, head_dim=H)

    return pl.pallas_call(
        kernel,
        out_shape=jax.ShapeDtypeStruct((B, T, H), x.dtype),
        in_specs=[
            pl.BlockSpec(memory_space=pltpu.MemorySpace.VMEM),   # x (whole)
            pl.BlockSpec(memory_space=pltpu.MemorySpace.VMEM),   # fused W_qkv
        ],
        out_specs=pl.BlockSpec(memory_space=pltpu.MemorySpace.VMEM),
    )(x, w_qkv)


def attention_ref(x, wq_t, wk_t, wv_t):
    """Pure-JAX reference matching the PyTorch forward."""
    B, T, C = x.shape
    q = x @ wq_t
    k = x @ wk_t
    v = x @ wv_t
    w = jnp.einsum("btd,bsd->bts", q, k) * (C ** -0.5)
    mask = jnp.tril(jnp.ones((T, T), dtype=bool))
    w = jnp.where(mask, w, -jnp.inf)
    w = jax.nn.softmax(w, axis=-1)
    return jnp.einsum("bts,bsd->btd", w, v)


if __name__ == "__main__":
    key = jax.random.PRNGKey(0)
    kx, kq, kk, kv = jax.random.split(key, 4)

    # Deterministic synthetic parameters.  nn.Linear(embd_dim, head_dim,
    # bias=False) stores weight of shape (head_dim, embd_dim); initialize in
    # that shape then transpose once for the kernel.
    x = jax.random.normal(kx, (BATCH, CONTEXT_SIZE, EMBD_DIM), jnp.float32)
    wq = jax.random.normal(kq, (HEAD_DIM, EMBD_DIM), jnp.float32) * 0.02
    wk = jax.random.normal(kk, (HEAD_DIM, EMBD_DIM), jnp.float32) * 0.02
    wv = jax.random.normal(kv, (HEAD_DIM, EMBD_DIM), jnp.float32) * 0.02

    wq_t, wk_t, wv_t = wq.T, wk.T, wv.T           # (C, H)

    out = attention(x, wq_t, wk_t, wv_t)
    out = jax.block_until_ready(out)

    ref = attention_ref(x, wq_t, wk_t, wv_t)
    assert out.shape == (BATCH, CONTEXT_SIZE, HEAD_DIM)
    # Slightly looser tolerance than pure-f32: the softmax denominator uses
    # the EUP approximate reciprocal (pl.reciprocal(approx=True)).
    assert jnp.allclose(out, ref, atol=2e-3, rtol=2e-3), "mismatch vs reference"

    print("KERNEL_OK")
</pallas_src>

<mosaic_0001>
module attributes {stable_mosaic.version = 11 : i64} {
  func.func @_attn_kernel(%arg0: memref<2x8x32xf32, #tpu.memory_space<vmem>>, %arg1: memref<32x48xf32, #tpu.memory_space<vmem>>, %arg2: memref<2x8x16xf32, #tpu.memory_space<vmem>>) attributes {dimension_semantics = [], scalar_prefetch = 0 : i64, scratch_operands = 0 : i64, tpu.core_type = #tpu.core_type<tc>} {
    %c0 = arith.constant 0 : index
    %c0_0 = arith.constant 0 : index
    %c0_1 = arith.constant 0 : index
    %0 = vector.load %arg0[%c0, %c0_0, %c0_1] : memref<2x8x32xf32, #tpu.memory_space<vmem>>, vector<2x8x32xf32>
    %1 = vector.shape_cast %0 : vector<2x8x32xf32> to vector<16x32xf32>
    %c0_2 = arith.constant 0 : index
    %c0_3 = arith.constant 0 : index
    %2 = vector.load %arg1[%c0_2, %c0_3] : memref<32x48xf32, #tpu.memory_space<vmem>>, vector<32x48xf32>
    %cst = arith.constant dense<0.000000e+00> : vector<16x48xf32>
    %3 = tpu.matmul %1, %2, %cst {dimension_numbers = #tpu.dot_dimension_numbers<[1], [0], [0], [1], [0, 0, 1, 1], [], []>} : vector<16x32xf32>, vector<32x48xf32>, vector<16x48xf32> -> vector<16x48xf32>
    %4 = vector.extract_strided_slice %3 {offsets = [0, 0], sizes = [16, 16], strides = [1, 1]} : vector<16x48xf32> to vector<16x16xf32>
    %5 = vector.shape_cast %4 : vector<16x16xf32> to vector<2x8x16xf32>
    %6 = vector.extract_strided_slice %3 {offsets = [0, 16], sizes = [16, 16], strides = [1, 1]} : vector<16x48xf32> to vector<16x16xf32>
    %7 = vector.shape_cast %6 : vector<16x16xf32> to vector<2x8x16xf32>
    %8 = vector.extract_strided_slice %3 {offsets = [0, 32], sizes = [16, 16], strides = [1, 1]} : vector<16x48xf32> to vector<16x16xf32>
    %9 = vector.shape_cast %8 : vector<16x16xf32> to vector<2x8x16xf32>
    "tpu.trace_start"() <{level = 10 : i32, message = "btd,bsd->bts"}> : () -> ()
    %cst_4 = arith.constant dense<0.000000e+00> : vector<2x8x8xf32>
    %10 = tpu.matmul %5, %7, %cst_4 {dimension_numbers = #tpu.dot_dimension_numbers<[2], [2], [1], [1], [0, 0, 0, 1, 1, 1], [0], [0]>} : vector<2x8x16xf32>, vector<2x8x16xf32>, vector<2x8x8xf32> -> vector<2x8x8xf32>
    "tpu.trace_stop"() : () -> ()
    %11 = tpu.iota {dimensions = array<i32: 0>} : vector<8x8xi32>
    %12 = tpu.iota {dimensions = array<i32: 1>} : vector<8x8xi32>
    %13 = arith.cmpi sle, %12, %11 : vector<8x8xi32>
    %14 = vector.shape_cast %13 : vector<8x8xi1> to vector<1x8x8xi1>
    %cst_5 = arith.constant -1.70141173E+38 : f32
    %15 = vector.shape_cast %14 : vector<1x8x8xi1> to vector<1x8x8xi1>
    %16 = vector.broadcast %15 : vector<1x8x8xi1> to vector<2x8x8xi1>
    %17 = vector.broadcast %cst_5 : f32 to vector<2x8x8xf32>
    %18 = arith.select %16, %10, %17 : vector<2x8x8xi1>, vector<2x8x8xf32>
    %cst_6 = arith.constant dense<0xFF800000> : vector<2x8xf32>
    %19 = vector.multi_reduction <maximumf>, %18, %cst_6 [2] : vector<2x8x8xf32> to vector<2x8xf32>
    %20 = vector.shape_cast %19 : vector<2x8xf32> to vector<2x8x1xf32>
    %21 = vector.broadcast %20 : vector<2x8x1xf32> to vector<2x8x8xf32>
    %22 = arith.subf %18, %21 : vector<2x8x8xf32>
    %23 = math.exp %22 : vector<2x8x8xf32>
    %cst_7 = arith.constant dense<0.000000e+00> : vector<2x8xf32>
    %24 = vector.multi_reduction <add>, %23, %cst_7 [2] : vector<2x8x8xf32> to vector<2x8xf32>
    %25 = vector.shape_cast %24 : vector<2x8xf32> to vector<2x8x1xf32>
    %26 = tpu.reciprocal %25 {approx = true} : vector<2x8x1xf32> -> vector<2x8x1xf32>
    %27 = vector.broadcast %26 : vector<2x8x1xf32> to vector<2x8x8xf32>
    %28 = arith.mulf %23, %27 : vector<2x8x8xf32>
    "tpu.trace_start"() <{level = 10 : i32, message = "bts,bsd->btd"}> : () -> ()
    %cst_8 = arith.constant dense<0.000000e+00> : vector<2x8x16xf32>
    %29 = tpu.matmul %28, %9, %cst_8 {dimension_numbers = #tpu.dot_dimension_numbers<[2], [1], [1], [2], [0, 0, 0, 1, 1, 2], [0], [0]>} : vector<2x8x8xf32>, vector<2x8x16xf32>, vector<2x8x16xf32> -> vector<2x8x16xf32>
    "tpu.trace_stop"() : () -> ()
    %c0_9 = arith.constant 0 : index
    %c0_10 = arith.constant 0 : index
    %c0_11 = arith.constant 0 : index
    %30 = vector.load %arg2[%c0_9, %c0_10, %c0_11] : memref<2x8x16xf32, #tpu.memory_space<vmem>>, vector<2x8x16xf32>
    tpu.vector_store %arg2[%c0_9, %c0_10, %c0_11], %29 {strides = array<i32>} : memref<2x8x16xf32, #tpu.memory_space<vmem>>, vector<2x8x16xf32>,
    return
  }
}

</mosaic_0001>

<bundles_post_ra>
// kernel: tpu_custom_call.1
= control target key start
LH: loop header
LB: loop body
LE: loop exit
PB: predicated region body
PF: predicated region fallthrough
CT: control target
= control target key end

     0   :  { %7 = vsyncpa [#allocation3], 0  ;;  %s683_s0 = inlined_call_operand.hbm [shape: f32[2,8,32], index: 0, kind: input, shape index: {}]   ;;  %s684_s1 = inlined_call_operand.hbm [shape: f32[32,48], index: 1, kind: input, shape index: {}]   ;;  %s685_s2 = inlined_call_operand.hbm [shape: f32[2,8,16], index: 2, kind: output, shape index: {}]  }
   0x1   :  { %8 = vsyncpa [#allocation6], 0 }
   0x2   :  { %9 = vsyncpa [#allocation4], 0  ;;  %s623_s9 = smov [#allocation2]  }
   0x3   :  { %s15_s10 = sshll.u32 %s623_s9, 4  ;;  %s16_s10 = int_to_ptr.vmem [resolvable:$true] %s15_s10 }
   0x4   :  { %s565_s11 = scalar_lea.vmem %s16_s10, 256  ;;  %p570_p1 = scmp.lt.s32.totalorder %s16_s10, %s16_s10 }
   0x5   :  { %p566_p0 = scmp.ne.s32.totalorder %s16_s10, %s565_s11  ;;  %p571_p2 = scmp.lt.s32.totalorder %s565_s11, %s565_s11 }
   0x7   :  { %p572_p3 = por %p571_p2, %p570_p1 }
   0x9   :  { %p573_p4 = pnand %p572_p3, %p566_p0 }
   0xb   :  { %576 = shalt.err (!%p573_p4)
}
   0xc   :  { %s624_s12 = smov 128   ;;  %s625_s13 = smov 8  }
   0xd   :  { %21 = dma.hbm_to_vmem [thread:$0]  %s683_s0, 256, %s16_s10, [#allocation3], %s624_s12, %s624_s12, %s625_s13  }
   0xe   :  { %s626_s16 = smov [#allocation5]  }
   0xf   :  { %s27_s17 = sshll.u32 %s626_s16, 4  ;;  %s28_s17 = int_to_ptr.vmem [resolvable:$true] %s27_s17 }
  0x10   :  { %s585_s18 = scalar_lea.vmem %s28_s17, 512  ;;  %p590_p6 = scmp.lt.s32.totalorder %s28_s17, %s28_s17 }
  0x11   :  { %p586_p5 = scmp.ne.s32.totalorder %s28_s17, %s585_s18  ;;  %p591_p7 = scmp.lt.s32.totalorder %s585_s18, %s585_s18 }
  0x13   :  { %p592_p8 = por %p591_p7, %p590_p6 }
  0x15   :  { %p593_p9 = pnand %p592_p8, %p586_p5 }
  0x17   :  { %596 = shalt.err (!%p593_p9)
}
  0x18   :  { %33 = dma.hbm_to_vmem [thread:$0]  %s684_s1, 512, %s28_s17, [#allocation6], %s624_s12, %s624_s12, %s625_s13  }
  0x19   :  { %617 = dma.done.wait [#allocation3], 256  }
  0x1a   :  { %618 = vsyncadd [#allocation3], 4294967040 }
  0x1b   :  { %619 = dma.done.wait [#allocation6], 512  }
  0x1c   :  { %620 = vsyncadd [#allocation6], 4294966784  ;;  %vm46_vm0 = vcmask 261120   ;;  %v45_v0 = vld [vmem:[#allocation5 + $0x18] sm:$0xff]  ;;  %v44_v1 = vld [vmem:[#allocation5 + $0x10] sm:$0xff]  ;;  %v627_v6 = vmov 0.0   ;;  %v283_v11 = vlaneseq }
  0x1d   :  { %509 = vmatprep.subr.mxu0 %v45_v0  ;;  %v40_v2 = vld [vmem:[#allocation2] sm:$0xff]  ;;  %v43_v3 = vld [vmem:[#allocation5 + $0x8] sm:$0xff]  ;;  %v42_v4 = vld [vmem:[#allocation5] sm:$0xff]  ;;  %520 = vmatprep.subr.mxu1 %v627_v6  ;;  %vm628_vm1 = vmmov 0   ;;  %s629_s0 = smov 112   ;;  %vm131_vm2 = vcmask 130048  }
  0x1e   :  { %510 = vmatpush3.msra.mxu0 %v45_v0  ;;  %517 = vmatprep.mubr.msk.f32.mxu0 %vm46_vm0, %v40_v2  ;;  %v41_v5 = vld [vmem:[#allocation2 + $0x8] sm:$0xff]  ;;  %v284_v12 = vshrl.u32 %v283_v11, 7  ;;  %v286_v13 = vand.u32 127, %v283_v11  ;;  %vm292_vm4 = vcmask 64512   ;;  %s630_s1 = smov 96   ;;  %s631_s21 = smov [#allocation7]  }
  0x1f   :  { %511 = vmatprep.subr.mxu0 %v44_v1  ;;  %522 = vmatprep.mubr.msk.f32.mxu1 %vm628_vm1, %v627_v6  ;;  %s474_s22 = sshll.u32 %s631_s21, 4  ;;  %s475_s22 = int_to_ptr.vmem [resolvable:$true] %s474_s22 }
  0x20   :  { %512 = vmatpush3.msra.mxu0 %v44_v1  ;;  %vm287_vm3 = vcmp.le.s32.totalorder %v286_v13, %v284_v12  ;;  %s597_s23 = scalar_lea.vmem %s475_s22, 256  ;;  %p602_p11 = scmp.lt.s32.totalorder %s475_s22, %s475_s22 }
  0x21   :  { %513 = vmatprep.subr.mxu0 %v43_v3  ;;  %p598_p10 = scmp.ne.s32.totalorder %s475_s22, %s597_s23  ;;  %p603_p12 = scmp.lt.s32.totalorder %s597_s23, %s597_s23 }
  0x22   :  { %514 = vmatpush3.msra.mxu0 %v43_v3 }
  0x23   :  { %515 = vmatprep.subr.mxu0 %v42_v4  ;;  %p604_p13 = por %p603_p12, %p602_p11 }
  0x24   :  { %516 = vmatpush3.msra.mxu0 %v42_v4 }
  0x25   :  { %518 = vmatmul.mubr.msk.f32.vlgmr.msra.gmra.mxu0 %vm46_vm0, %v41_v5  ;;  %530 = vmatprep.subr.mxu0 %v627_v6  ;;  %p605_p0 = pnand %p604_p13, %p598_p10 }
  0x26   :  { %532 = vmatprep.mubr.msk.f32.mxu0 %vm628_vm1, %v627_v6 }
  0xe5   :  { %v519_v7 = vpop.f32.mrf.mxu0 }
  0xe7   :  { %v119_v8 = vpop.f32.mrf.mxu0 }
  0xe8   :  { %129 = vrot.lane.b32.xlu0 %v119_v8, %s629_s0 }
  0xec   :  { %207 = vrot.lane.b32.xlu0 %v519_v7, %s629_s0 }
 0x15a   :  { %v130_v9 = vpop.permute.xlu0 %129 }
 0x15b   :  { %521 = vmatpush3.xpose.msk.msra.mxu1 %vm131_vm2, %v130_v9 }
 0x15c   :  { %525 = vmatprep.subr.mxu1 %v627_v6 }
 0x15e   :  { %523 = vmatmul.mubr.msk.f32.vlgmr.msra.gmra.mxu1 %vm131_vm2, %v119_v8  ;;  %v208_v10 = vpop.permute.xlu0 %207 }
 0x15f   :  { %526 = vmatpush3.xpose.msk.msra.mxu1 %vm131_vm2, %v208_v10  ;;  %527 = vmatprep.mubr.msk.f32.mxu1 %vm628_vm1, %v627_v6 }
 0x160   :  { %535 = vmatprep.subr.mxu1 %v627_v6 }
 0x162   :  { %528 = vmatmul.mubr.msk.f32.vlgmr.msra.gmra.mxu1 %vm131_vm2, %v519_v7 }
 0x163   :  { %537 = vmatprep.mubr.msk.f32.mxu1 %vm628_vm1, %v627_v6 }
 0x21e   :  { %v202_v14 = vpop.f32.mrf.mxu1 }
 0x21f   :  { %v290_v15 = vsel %vm287_vm3, %v202_v14, -1.7014117e+38 }
 0x220   :  { %v524_v16 = vpop.f32.mrf.mxu1  ;;  %v293_v17 = vsel %vm292_vm4, %v290_v15, -inf }
 0x221   :  { %294 = vmax.xlane.f32.xlu1 %v293_v17 }
 0x222   :  { %v279_v18 = vpop.f32.mrf.mxu1 }
 0x223   :  { %v291_v19 = vsel %vm287_vm3, %v279_v18, -1.7014117e+38 }
 0x224   :  { %v529_v20 = vpop.f32.mrf.mxu1  ;;  %v296_v21 = vsel %vm292_vm4, %v291_v19, -inf }
 0x225   :  { %297 = vmax.xlane.f32.xlu1 %v296_v21 }
 0x236   :  { %315 = vrot.lane.b32.xlu1 %v119_v8, %s630_s1 }
 0x2aa   :  { %v295_v22 = vpop.xlane.xlu1 %294 }
 0x2ab   :  { %v299_v23 = vsub.f32 %v290_v15, %v295_v22 }
 0x2ad   :  { %v301_v24 = vmul.f32 1.442695, %v299_v23 }
 0x2ae   :  { %v298_v25 = vpop.xlane.xlu1 %297 }
 0x2af   :  { %549 = vpow2.f32 %v301_v24  ;;  %v300_v26 = vsub.f32 %v291_v19, %v298_v25 }
 0x2b1   :  { %v303_v27 = vmul.f32 1.442695, %v300_v26 }
 0x2b2   :  { %v316_v28 = vpop.permute.xlu1 %315 }
 0x2b3   :  { %551 = vpow2.f32 %v303_v27  ;;  %531 = vmatpush3.msra.mxu0 %v316_v28 }
 0x2bc   :  { %v550_v29 = vpop.eup %549 }
 0x2bd   :  { %v305_v30 = vsel %vm292_vm4, %v550_v29, 0.0 }
 0x2be   :  { %306 = vadd.xlane.f32.xlu0 %v305_v30 }
 0x2c0   :  { %v552_v31 = vpop.eup %551 }
 0x2c1   :  { %v308_v32 = vsel %vm292_vm4, %v552_v31, 0.0 }
 0x2c2   :  { %309 = vadd.xlane.f32.xlu1 %v308_v32 }
 0x2d3   :  { %391 = vrot.lane.b32.xlu1 %v519_v7, %s630_s1 }
 0x347   :  { %v307_v33 = vpop.xlane.xlu0 %306 }
 0x348   :  { %553 = vrcp.f32 %v307_v33 }
 0x34b   :  { %v310_v34 = vpop.xlane.xlu1 %309 }
 0x34c   :  { %555 = vrcp.f32 %v310_v34 }
 0x34f   :  { %v392_v35 = vpop.permute.xlu1 %391 }
 0x350   :  { %536 = vmatpush3.msra.mxu1 %v392_v35 }
 0x355   :  { %v554_v36 = vpop.eup %553 }
 0x356   :  { %v313_v37 = vmul.f32 %v554_v36, %v550_v29 }
 0x358   :  { %533 = vmatmul.mubr.msk.f32.vlgmr.msra.gmra.mxu0 %vm292_vm4, %v313_v37 }
 0x359   :  { %v556_v38 = vpop.eup %555 }
 0x35a   :  { %v314_v39 = vmul.f32 %v556_v38, %v552_v31 }
 0x35c   :  { %538 = vmatmul.mubr.msk.f32.vlgmr.msra.gmra.mxu1 %vm292_vm4, %v314_v39 }
 0x418   :  { %v387_v40 = vpop.f32.mrf.mxu0 }
 0x419   :  { %467 = vst.msk [vmem:[#allocation7] sm:$0xff] %vm131_vm2, %v387_v40 }
 0x41a   :  { %v534_v41 = vpop.f32.mrf.mxu0 }
 0x41c   :  { %v463_v42 = vpop.f32.mrf.mxu1 }
 0x41d   :  { %468 = vst.msk [vmem:[#allocation7 + $0x8] sm:$0xff] %vm131_vm2, %v463_v42 }
 0x41e   :  { %v539_v43 = vpop.f32.mrf.mxu1 }
 0x41f   :  { %608 = shalt.err (!%p605_p0)
}
 0x420   :  { %480 = dma.vmem_to_hbm [thread:$0]  %s475_s22, 256, %s685_s2, [#allocation4], %s624_s12, %s624_s12, %s625_s13  }
 0x421   :  { %621 = dma.done.wait [#allocation4], 256  }
 0x422   :  { %622 = vsyncadd [#allocation4], 4294967040 }
 0x423   :  { %484 = vsyncpa [#allocation3], 1 }
 0x424   :  { %485 = vsyncpa [#allocation6], 1 }
 0x425   :  { %486 = vsyncpa [#allocation4], 1 }

</bundles_post_ra>
